<compile_context>
chip_gen: v7x
topology: tpu7x:2x2x1
jax: 0.10.0
libtpu: 0.0.40
codegen_flags: <defaults>
</compile_context>

<pallas_src>
import functools
import math

import jax
import jax.numpy as jnp
from jax.experimental import pallas as pl
from jax.experimental.pallas import tpu as pltpu


def _round_up(x, m):
    return ((x + m - 1) // m) * m


# ----------------------------- Pallas kernel --------------------------------

def _elu(v):
    # ELU (encoder_activation='elu').  exp-1 form (safe Mosaic lowering); difference vs
    # expm1 is far below the 1e-4 test tolerance.
    return jnp.where(v > 0, v, jnp.exp(jnp.minimum(v, 0.0)) - 1.0)


def _slpe_kernel(out_pad, h2, n_fc, rb, xin_ref, slab_ref, out_ref):
    """Fully fused forward of SimpleLearnablePriorEncoder (prior + post encoders).

    xin  (tile_b, W_in): [obs | tgt | 1 | eps | 0-pad]            (W_in multiple of 128)
    slab (rb + 2H, XW):
       rows [0, rb)        x-dependent weights (+ biases via ones row, + std*I on eps rows)
       rows [rb, rb+2H)    block-diagonal res weights of both encoders
    columns of slab / x_all:
       [0, out_pad)                    output head: [out0|out1|out2|0-pad]  (out_pad=128k)
       [out_pad + 2H*i, out_pad+2H*(i+1))  layer i:  [prior (H) | post (H)]
    """
    # One hoisted matmul carries every layer's x-dependent part, all biases and eps*std.
    x_all = jnp.dot(xin_ref[...], slab_ref[0:rb, :],
                    preferred_element_type=jnp.float32)

    # Layer 0 of both encoders (entirely contained in x_all).
    res = _elu(x_all[:, out_pad:out_pad + h2])          # (tile_b, 2H) = [res_prior|res_post]

    # Hidden layers 1..n_fc-1: block-diagonal res matmul + hoisted x slice.
    for i in range(1, n_fc):
        w = slab_ref[rb:rb + h2, out_pad + h2 * (i - 1):out_pad + h2 * i]   # (2H, 2H)
        res = _elu(x_all[:, out_pad + h2 * i:out_pad + h2 * (i + 1)]
                   + jnp.dot(res, w, preferred_element_type=jnp.float32))

    # Output head: one (2H, out_pad) matmul produces the padded, lane-dense
    # [z+mu_prior | mu_prior+mu_post | mu_prior | 0] block directly.  Single store.
    out_ref[...] = x_all[:, 0:out_pad] + jnp.dot(
        res, slab_ref[rb:rb + h2, 0:out_pad], preferred_element_type=jnp.float32)


# ----------------------------- weight packing --------------------------------

def _pack_slab(prior_params, post_params, cond, din, hid, out_size,
               n_hidden_layers, std):
    """Pack both encoders into one contiguous f32 slab (layout: see kernel docstring)."""
    n_fc = n_hidden_layers + 1
    H, H2 = hid, 2 * hid
    out_pad = _round_up(3 * out_size, 128)
    ones_row = cond + din
    eps_row = cond + din + 1
    w_in = _round_up(cond + din + 1 + out_size, 128)   # packed input width
    rb = w_in                                          # res-weight rows start (8-aligned)
    xw = out_pad + H2 * n_fc
    slab = jnp.zeros((rb + H2, xw), jnp.float32)

    p_fcs, p_mu = prior_params["fcs"], prior_params["mu"]
    q_fcs, q_mu = post_params["fcs"], post_params["mu"]

    def lcol(i):                     # column base of layer i
        return out_pad + H2 * i

    # ---- output head columns [0:out_pad) : [out0 | out1 | out2 | 0-pad] ----
    #   out0 = mu_prior + mu_post + std*eps   (= latent_code + mu_prior)
    #   out1 = mu_prior + mu_post
    #   out2 = mu_prior
    wmp, bmp = p_mu                  # (cond + H, out)
    wmq, bmq = q_mu                  # (din  + H, out)
    for blk, with_post, with_eps in ((0, True, True), (1, True, False), (2, False, False)):
        c = blk * out_size
        slab = slab.at[0:cond, c:c + out_size].set(wmp[:cond])
        slab = slab.at[rb:rb + H, c:c + out_size].set(wmp[cond:])
        bias = bmp
        if with_post:
            slab = slab.at[cond:cond + din, c:c + out_size].set(wmq[:din])
            slab = slab.at[rb + H:rb + H2, c:c + out_size].set(wmq[din:])
            bias = bias + bmq
        if with_eps:
            slab = slab.at[eps_row:eps_row + out_size, c:c + out_size].set(
                jnp.float32(std) * jnp.eye(out_size, dtype=jnp.float32))
        slab = slab.at[ones_row, c:c + out_size].set(bias)

    # ---- layer 0 (prior: obs ; post: cat([tgt, obs])) ----
    w0p, b0p = p_fcs[0]              # (cond, H)
    w0q, b0q = q_fcs[0]              # (din + cond, H)
    c = lcol(0)
    slab = slab.at[0:cond, c:c + H].set(w0p)
    slab = slab.at[ones_row, c:c + H].set(b0p)
    slab = slab.at[cond:cond + din, c + H:c + H2].set(w0q[:din])
    slab = slab.at[0:cond, c + H:c + H2].set(w0q[din:din + cond])
    slab = slab.at[ones_row, c + H:c + H2].set(b0q)

    # ---- hidden layers 1..n_fc-1 ----
    for i in range(1, n_fc):
        wp, bp = p_fcs[i]            # (cond + H, H)
        wq, bq = q_fcs[i]            # (din  + H, H)
        c = lcol(i)
        slab = slab.at[0:cond, c:c + H].set(wp[:cond])
        slab = slab.at[ones_row, c:c + H].set(bp)
        slab = slab.at[cond:cond + din, c + H:c + H2].set(wq[:din])
        slab = slab.at[ones_row, c + H:c + H2].set(bq)
        rc = lcol(i - 1)             # block-diagonal res weights for layer i
        slab = slab.at[rb:rb + H, rc:rc + H].set(wp[cond:])
        slab = slab.at[rb + H:rb + H2, rc + H:rc + H2].set(wq[din:])

    return slab, rb, w_in, out_pad


def _pack_inputs(obs, tgt, eps, w_in):
    """[obs | tgt | ones | eps | 0-pad] -> single lane-dense (B, w_in) f32 input."""
    B = obs.shape[0]
    used = obs.shape[1] + tgt.shape[1] + 1 + eps.shape[1]
    parts = [obs.astype(jnp.float32), tgt.astype(jnp.float32),
             jnp.ones((B, 1), jnp.float32), eps.astype(jnp.float32)]
    if w_in > used:
        parts.append(jnp.zeros((B, w_in - used), jnp.float32))
    return jnp.concatenate(parts, axis=-1)


# ----------------------------- tiling helpers ---------------------------------

def _num_tensorcores():
    """Best-effort TensorCore count (v7x: 2 TCs/chip -> want >= 2 grid steps)."""
    try:
        info = pltpu.get_tpu_info()
        for name in ("num_cores", "core_count", "num_tensorcores",
                     "tensorcore_count", "cores_per_chip", "num_tensor_cores"):
            v = getattr(info, name, None)
            if isinstance(v, int) and 1 <= v <= 8:
                return v
    except Exception:
        pass
    try:
        kind = jax.devices()[0].device_kind.lower()
        if "v7" in kind:
            return 2
    except Exception:
        pass
    return 1


def _choose_tile_b(batch, min_steps=1, cap=2048):
    """Largest 8-aligned divisor of `batch`, <= cap, giving >= min_steps grid steps."""
    if batch % 8 != 0 or batch // max(min_steps, 1) < 8:
        return batch                                    # tiny / awkward batch: one block
    cap = min(cap, batch // max(min_steps, 1))
    cap = max(8, (cap // 8) * 8)
    best = 8
    d = 1
    while d * d <= batch:
        if batch % d == 0:
            for t in (d, batch // d):
                if t % 8 == 0 and t <= cap and t > best:
                    best = t
        d += 1
    return best


# ----------------------------- wrapper ---------------------------------------

def simple_learnable_prior_encoder_forward(n_observation, n_target, eps,
                                           prior_params, post_params,
                                           fix_var, n_hidden_layers):
    B, cond = n_observation.shape
    _, din = n_target.shape
    _, out_size = eps.shape
    hid = prior_params["fcs"][0][0].shape[1]
    n_fc = n_hidden_layers + 1
    h2 = 2 * hid

    # torch: logvar = 2*log(fix_var) -> std = exp(0.5*logvar) = fix_var
    std = float(fix_var)

    slab, rb, w_in, out_pad = _pack_slab(prior_params, post_params, cond, din,
                                         hid, out_size, n_hidden_layers, std)
    xin = _pack_inputs(n_observation, n_target, eps, w_in)

    tile_b = _choose_tile_b(B, min_steps=_num_tensorcores())
    grid = (B // tile_b,)

    kernel = functools.partial(_slpe_kernel, out_pad, h2, n_fc, rb)

    xw = slab.shape[1]
    flops = 2 * B * (w_in * xw + (n_fc - 1) * h2 * h2 + h2 * out_pad)
    bytes_accessed = 4 * (B * (w_in + out_pad) + slab.size)

    out = pl.pallas_call(
        kernel,
        out_shape=jax.ShapeDtypeStruct((B, out_pad), jnp.float32),
        grid=grid,
        in_specs=[
            pl.BlockSpec((tile_b, w_in), lambda i: (i, 0)),
            # Constant index_map -> slab is DMA'd once and stays resident across steps.
            pl.BlockSpec(slab.shape, lambda i: (0, 0)),
        ],
        out_specs=pl.BlockSpec((tile_b, out_pad), lambda i: (i, 0)),
        compiler_params=pltpu.CompilerParams(dimension_semantics=("parallel",)),
        cost_estimate=pl.CostEstimate(flops=flops,
                                      transcendentals=B * h2 * n_fc,
                                      bytes_accessed=bytes_accessed),
    )(xin, slab)

    z_plus_mu_prior = out[:, 0:out_size]
    mu_sum = out[:, out_size:2 * out_size]
    mu_prior = out[:, 2 * out_size:3 * out_size]
    return z_plus_mu_prior, mu_sum, mu_prior


# ----------------------------- param init ------------------------------------

def _init_linear(key, fan_in, fan_out):
    k1, k2 = jax.random.split(key)
    bound = 1.0 / math.sqrt(fan_in)
    w = jax.random.uniform(k1, (fan_in, fan_out), jnp.float32, -bound, bound)
    b = jax.random.uniform(k2, (fan_out,), jnp.float32, -bound, bound)
    return w, b


def _init_encoder(key, input_size, condition_size, hidden, n_hidden_layers,
                  output_size):
    keys = jax.random.split(key, n_hidden_layers + 2)
    fcs = [_init_linear(keys[0], input_size + condition_size, hidden)]
    for i in range(n_hidden_layers):
        fcs.append(_init_linear(keys[i + 1], input_size + hidden, hidden))
    mu = _init_linear(keys[-1], input_size + hidden, output_size)
    return {"fcs": fcs, "mu": mu}


# ----------------------------- pure-JAX reference ----------------------------

def _ref_encoder_mu(x, c, params):
    res = c
    for w, b in params["fcs"]:
        inp = x if res is None else jnp.concatenate([x, res], axis=-1)
        res = jax.nn.elu(inp @ w + b)
    latent = jnp.concatenate([x, res], axis=-1)
    w, b = params["mu"]
    return latent @ w + b


def _ref_forward(n_obs, n_tgt, eps, prior_params, post_params, fix_var):
    mu_prior = _ref_encoder_mu(n_obs, None, prior_params)
    mu_post = _ref_encoder_mu(n_tgt, n_obs, post_params)
    logvar = math.log(fix_var) * 2.0
    z = mu_post + eps * jnp.exp(0.5 * jnp.float32(logvar))
    return z + mu_prior, mu_prior + mu_post, mu_prior


# ----------------------------- main -------------------------------------------

if __name__ == "__main__":
    B = 8             # batch
    INPUT_SIZE = 16   # n_target feature dim
    COND_SIZE = 16    # n_observation feature dim
    OUTPUT_SIZE = 16  # latent dim
    HIDDEN = 32       # encoder_hidden_layer_size
    N_LAYERS = 2      # encoder_hidden_layer_num
    FIX_VAR = 0.3     # fix_var

    key = jax.random.PRNGKey(0)
    k_obs, k_tgt, k_eps, k_prior, k_post = jax.random.split(key, 5)

    n_observation = jax.random.normal(k_obs, (B, COND_SIZE), jnp.float32)
    n_target = jax.random.normal(k_tgt, (B, INPUT_SIZE), jnp.float32)
    # TODO(synk): torch.randn_like noise is generated host-side (jax.random) and packed
    # into the fused input; its std scaling is baked into the weight slab.
    eps = jax.random.normal(k_eps, (B, OUTPUT_SIZE), jnp.float32)

    # prior: Encoder(input_size=condition_size, condition_size=0)
    prior_params = _init_encoder(k_prior, COND_SIZE, 0, HIDDEN, N_LAYERS,
                                 OUTPUT_SIZE)
    # post:  Encoder(input_size=input_size, condition_size=condition_size)
    post_params = _init_encoder(k_post, INPUT_SIZE, COND_SIZE, HIDDEN, N_LAYERS,
                                OUTPUT_SIZE)

    outs = simple_learnable_prior_encoder_forward(
        n_observation, n_target, eps, prior_params, post_params,
        FIX_VAR, N_LAYERS)
    outs = jax.block_until_ready(outs)

    refs = _ref_forward(n_observation, n_target, eps, prior_params,
                        post_params, FIX_VAR)
    for got, want in zip(outs, refs):
        assert got.shape == want.shape and got.dtype == want.dtype
        assert jnp.allclose(got, want, atol=1e-4, rtol=1e-4), \
            float(jnp.max(jnp.abs(got - want)))

    print("KERNEL_OK")
</pallas_src>

<mosaic_0001>
module attributes {stable_mosaic.version = 11 : i64} {
  func.func @_slpe_kernel(%arg0: i32, %arg1: memref<8x128xf32, #tpu.memory_space<vmem>>, %arg2: memref<192x320xf32, #tpu.memory_space<vmem>>, %arg3: memref<8x128xf32, #tpu.memory_space<vmem>>) attributes {dimension_semantics = [#tpu.dimension_semantics<parallel>], iteration_bounds = array<i64: 1>, scalar_prefetch = 0 : i64, scratch_operands = 0 : i64, tpu.core_type = #tpu.core_type<tc>, window_params = [{transform_indices = @transform_0, window_bounds = array<i64: 8, 128>}, {pipeline_mode = #tpu.pipeline_mode<synchronous>, transform_indices = @transform_1, window_bounds = array<i64: 192, 320>}, {transform_indices = @transform_2, window_bounds = array<i64: 8, 128>}]} {
    %c0 = arith.constant 0 : index
    %c0_0 = arith.constant 0 : index
    %0 = vector.load %arg1[%c0, %c0_0] : memref<8x128xf32, #tpu.memory_space<vmem>>, vector<8x128xf32>
    %c0_1 = arith.constant 0 : index
    %c0_2 = arith.constant 0 : index
    %1 = vector.load %arg2[%c0_1, %c0_2] : memref<192x320xf32, #tpu.memory_space<vmem>>, vector<128x320xf32>
    %cst = arith.constant dense<0.000000e+00> : vector<8x320xf32>
    %2 = tpu.matmul %0, %1, %cst {dimension_numbers = #tpu.dot_dimension_numbers<[1], [0], [0], [1], [0, 0, 1, 1], [], []>} : vector<8x128xf32>, vector<128x320xf32>, vector<8x320xf32> -> vector<8x320xf32>
    %3 = vector.extract_strided_slice %2 {offsets = [0, 128], sizes = [8, 64], strides = [1, 1]} : vector<8x320xf32> to vector<8x64xf32>
    %cst_3 = arith.constant 0.000000e+00 : f32
    %4 = vector.broadcast %cst_3 : f32 to vector<8x64xf32>
    %5 = arith.cmpf ogt, %3, %4 : vector<8x64xf32>
    %cst_4 = arith.constant 0.000000e+00 : f32
    %6 = vector.broadcast %cst_4 : f32 to vector<8x64xf32>
    %7 = arith.minimumf %3, %6 : vector<8x64xf32>
    %8 = math.exp %7 : vector<8x64xf32>
    %cst_5 = arith.constant 1.000000e+00 : f32
    %9 = vector.broadcast %cst_5 : f32 to vector<8x64xf32>
    %10 = arith.subf %8, %9 : vector<8x64xf32>
    %11 = arith.select %5, %3, %10 : vector<8x64xi1>, vector<8x64xf32>
    %c128 = arith.constant 128 : index
    %c128_6 = arith.constant 128 : index
    %12 = vector.load %arg2[%c128, %c128_6] : memref<192x320xf32, #tpu.memory_space<vmem>>, vector<64x64xf32>
    %13 = vector.extract_strided_slice %2 {offsets = [0, 192], sizes = [8, 64], strides = [1, 1]} : vector<8x320xf32> to vector<8x64xf32>
    %cst_7 = arith.constant dense<0.000000e+00> : vector<8x64xf32>
    %14 = tpu.matmul %11, %12, %cst_7 {dimension_numbers = #tpu.dot_dimension_numbers<[1], [0], [0], [1], [0, 0, 1, 1], [], []>} : vector<8x64xf32>, vector<64x64xf32>, vector<8x64xf32> -> vector<8x64xf32>
    %15 = arith.addf %13, %14 : vector<8x64xf32>
    %cst_8 = arith.constant 0.000000e+00 : f32
    %16 = vector.broadcast %cst_8 : f32 to vector<8x64xf32>
    %17 = arith.cmpf ogt, %15, %16 : vector<8x64xf32>
    %cst_9 = arith.constant 0.000000e+00 : f32
    %18 = vector.broadcast %cst_9 : f32 to vector<8x64xf32>
    %19 = arith.minimumf %15, %18 : vector<8x64xf32>
    %20 = math.exp %19 : vector<8x64xf32>
    %cst_10 = arith.constant 1.000000e+00 : f32
    %21 = vector.broadcast %cst_10 : f32 to vector<8x64xf32>
    %22 = arith.subf %20, %21 : vector<8x64xf32>
    %23 = arith.select %17, %15, %22 : vector<8x64xi1>, vector<8x64xf32>
    %c128_11 = arith.constant 128 : index
    %c192 = arith.constant 192 : index
    %24 = vector.load %arg2[%c128_11, %c192] : memref<192x320xf32, #tpu.memory_space<vmem>>, vector<64x64xf32>
    %25 = vector.extract_strided_slice %2 {offsets = [0, 256], sizes = [8, 64], strides = [1, 1]} : vector<8x320xf32> to vector<8x64xf32>
    %cst_12 = arith.constant dense<0.000000e+00> : vector<8x64xf32>
    %26 = tpu.matmul %23, %24, %cst_12 {dimension_numbers = #tpu.dot_dimension_numbers<[1], [0], [0], [1], [0, 0, 1, 1], [], []>} : vector<8x64xf32>, vector<64x64xf32>, vector<8x64xf32> -> vector<8x64xf32>
    %27 = arith.addf %25, %26 : vector<8x64xf32>
    %cst_13 = arith.constant 0.000000e+00 : f32
    %28 = vector.broadcast %cst_13 : f32 to vector<8x64xf32>
    %29 = arith.cmpf ogt, %27, %28 : vector<8x64xf32>
    %cst_14 = arith.constant 0.000000e+00 : f32
    %30 = vector.broadcast %cst_14 : f32 to vector<8x64xf32>
    %31 = arith.minimumf %27, %30 : vector<8x64xf32>
    %32 = math.exp %31 : vector<8x64xf32>
    %cst_15 = arith.constant 1.000000e+00 : f32
    %33 = vector.broadcast %cst_15 : f32 to vector<8x64xf32>
    %34 = arith.subf %32, %33 : vector<8x64xf32>
    %35 = arith.select %29, %27, %34 : vector<8x64xi1>, vector<8x64xf32>
    %36 = vector.extract_strided_slice %2 {offsets = [0, 0], sizes = [8, 128], strides = [1, 1]} : vector<8x320xf32> to vector<8x128xf32>
    %c128_16 = arith.constant 128 : index
    %c0_17 = arith.constant 0 : index
    %37 = vector.load %arg2[%c128_16, %c0_17] : memref<192x320xf32, #tpu.memory_space<vmem>>, vector<64x128xf32>
    %cst_18 = arith.constant dense<0.000000e+00> : vector<8x128xf32>
    %38 = tpu.matmul %35, %37, %cst_18 {dimension_numbers = #tpu.dot_dimension_numbers<[1], [0], [0], [1], [0, 0, 1, 1], [], []>} : vector<8x64xf32>, vector<64x128xf32>, vector<8x128xf32> -> vector<8x128xf32>
    %39 = arith.addf %36, %38 : vector<8x128xf32>
    %c0_19 = arith.constant 0 : index
    %c0_20 = arith.constant 0 : index
    %40 = vector.load %arg3[%c0_19, %c0_20] : memref<8x128xf32, #tpu.memory_space<vmem>>, vector<8x128xf32>
    tpu.vector_store %arg3[%c0_19, %c0_20], %39 {strides = array<i32>} : memref<8x128xf32, #tpu.memory_space<vmem>>, vector<8x128xf32>,
    return
  }
  func.func @transform_0(%arg0: i32) -> (i32, i32) {
    %c0_i32 = arith.constant 0 : i32
    %c0_i32_0 = arith.constant 0 : i32
    return %arg0, %c0_i32 : i32, i32
  }
  func.func @transform_1(%arg0: i32) -> (i32, i32) {
    %c0_i32 = arith.constant 0 : i32
    %c0_i32_0 = arith.constant 0 : i32
    %c0_i32_1 = arith.constant 0 : i32
    return %c0_i32, %c0_i32_0 : i32, i32
  }
  func.func @transform_2(%arg0: i32) -> (i32, i32) {
    %c0_i32 = arith.constant 0 : i32
    %c0_i32_0 = arith.constant 0 : i32
    return %arg0, %c0_i32 : i32, i32
  }
}

</mosaic_0001>

<bundles_post_ra>
// kernel: tpu_custom_call.1
= control target key start
LH: loop header
LB: loop body
LE: loop exit
PB: predicated region body
PF: predicated region fallthrough
CT: control target
= control target key end

     0   :  { %7 = vsyncpa [#allocation3], 0  ;;  %s1001_s0 = inlined_call_operand.hbm [shape: f32[8,128], index: 0, kind: input, shape index: {}]   ;;  %s1002_s1 = inlined_call_operand.hbm [shape: f32[192,320], index: 1, kind: input, shape index: {}]   ;;  %s1003_s2 = inlined_call_operand.hbm [shape: f32[8,128], index: 2, kind: output, shape index: {}]  }
   0x1   :  { %8 = vsyncpa [#allocation6], 0 }
   0x2   :  { %9 = vsyncpa [#allocation4], 0  ;;  %s883_s9 = smov [#allocation2]   ;;  %s884_s11 = smov [#allocation5]  }
   0x3   :  { %s16_s10 = sshll.u32 %s883_s9, 4  ;;  %s25_s12 = sshll.u32 %s884_s11, 4  ;;  %s17_s10 = int_to_ptr.vmem [resolvable:$true] %s16_s10  ;;  %s907_s12 = int_to_ptr.vmem [resolvable:$true] %s25_s12 }
   0x4   :  { %s811_s15 = scalar_lea.hbm %s1001_s0, 128 }
   0x5   :  { %p812_p0 = scmp.ne.s32.totalorder %s1001_s0, %s811_s15  ;;  %p815_p1 = scmp.lt.u32.totalorder %s811_s15, %s1001_s0 }
   0x7   :  { %p817_p2 = pnand %p815_p1, %p812_p0 }
   0x9   :  { %820 = shalt.err (!%p817_p2)
}
   0xa   :  { %s821_s20 = scalar_lea.vmem %s17_s10, 128  ;;  %p826_p4 = scmp.lt.s32.totalorder %s17_s10, %s17_s10 }
   0xb   :  { %p822_p3 = scmp.ne.s32.totalorder %s17_s10, %s821_s20  ;;  %p827_p5 = scmp.lt.s32.totalorder %s821_s20, %s821_s20 }
   0xd   :  { %p828_p6 = por %p827_p5, %p826_p4 }
   0xf   :  { %p829_p7 = pnand %p828_p6, %p822_p3 }
  0x11   :  { %832 = shalt.err (!%p829_p7)
}
  0x12   :  { %19 = dma.hbm_to_vmem [thread:$0]  %s1001_s0, 128, %s17_s10, [#allocation3]  }
  0x13   :  { %s833_s25 = scalar_lea.hbm %s1002_s1, 9216 }
  0x14   :  { %p834_p8 = scmp.ne.s32.totalorder %s1002_s1, %s833_s25  ;;  %p837_p9 = scmp.lt.u32.totalorder %s833_s25, %s1002_s1 }
  0x16   :  { %p839_p10 = pnand %p837_p9, %p834_p8 }
  0x18   :  { %842 = shalt.err (!%p839_p10)
}
  0x19   :  { %s843_s30 = scalar_lea.vmem %s907_s12, 9216  ;;  %p848_p12 = scmp.lt.s32.totalorder %s907_s12, %s907_s12 }
  0x1a   :  { %p844_p11 = scmp.ne.s32.totalorder %s907_s12, %s843_s30  ;;  %p849_p13 = scmp.lt.s32.totalorder %s843_s30, %s843_s30 }
  0x1c   :  { %p850_p0 = por %p849_p13, %p848_p12 }
  0x1e   :  { %p851_p1 = pnand %p850_p0, %p844_p11 }
  0x20   :  { %854 = shalt.err (!%p851_p1)
}
  0x21   :  { %s885_s0 = smov 384   ;;  %s886_s3 = smov 24  }
  0x22   :  { %31 = dma.hbm_to_vmem [thread:$0]  %s1002_s1, 9216, %s907_s12, [#allocation6], %s885_s0, %s885_s0, %s886_s3  }
  0x23   :  { %877 = dma.done.wait [#allocation3], 128  }
  0x24   :  { %878 = vsyncadd [#allocation3], 4294967168 }
  0x25   :  { %879 = dma.done.wait [#allocation6], 9216  }
  0x26   :  { %880 = vsyncadd [#allocation6], 4294958080  ;;  %v887_v0 = vmov 0.0   ;;  %v40_v1 = vld [vmem:[#allocation5 + $0x8] sm:$0xff]  ;;  %v43_v2 = vld [vmem:[#allocation5 + $0x20] sm:$0xff]  ;;  %v888_v53 = vmov 0.0|0.0  }
  0x27   :  { %151 = vmatprep.mubr.f32.mxu0 %v887_v0  ;;  %v39_v3 = vld [vmem:[#allocation5] sm:$0xff]  ;;  %v682_v4 = vpack.c.bf16 %v43_v2, %v40_v1  ;;  %v42_v5 = vld [vmem:[#allocation5 + $0x18] sm:$0xff]  ;;  %v49_v7 = vld [vmem:[#allocation5 + $0x50] sm:$0xff]  ;;  %714 = vmatprep.subr.bf16.mxu1 %v888_v53  ;;  %vm889_vm0 = vmmov 0   ;;  %vm242_vm1 = vcmask 523264   ;;  %s890_s1 = smov 64  }
  0x28   :  { %v46_v6 = vld [vmem:[#allocation5 + $0x38] sm:$0xff]  ;;  %v684_v8 = vpack.c.bf16 %v42_v5, %v39_v3  ;;  %v45_v10 = vld [vmem:[#allocation5 + $0x30] sm:$0xff]  ;;  %v48_v11 = vld [vmem:[#allocation5 + $0x48] sm:$0xff]  ;;  %622 = vmatprep.mubr.msk.f32.mxu1 %vm889_vm0, %v887_v0  ;;  %s891_s6 = smov [#allocation7]  }
  0x29   :  { %v686_v9 = vpack.c.bf16 %v49_v7, %v46_v6  ;;  %v52_v12 = vld [vmem:[#allocation5 + $0x68] sm:$0xff]  ;;  %683 = vmatprep.subr.bf16.mxu0 %v682_v4  ;;  %v55_v13 = vld [vmem:[#allocation5 + $0x80] sm:$0xff]  ;;  %v688_v14 = vpack.c.bf16 %v48_v11, %v45_v10  ;;  %v54_v17 = vld [vmem:[#allocation5 + $0x78] sm:$0xff]  ;;  %s530_s7 = sshll.u32 %s891_s6, 4  ;;  %s531_s7 = int_to_ptr.vmem [resolvable:$true] %s530_s7 }
  0x2a   :  { %685 = vmatpush1.bf16.msra.mxu0 %v684_v8  ;;  %v690_v15 = vpack.c.bf16 %v55_v13, %v52_v12  ;;  %v51_v16 = vld [vmem:[#allocation5 + $0x60] sm:$0xff]  ;;  %v58_v18 = vld [vmem:[#allocation5 + $0x98] sm:$0xff]  ;;  %v61_v19 = vld [vmem:[#allocation5 + $0xb0] sm:$0xff]  ;;  %s855_s8 = scalar_lea.vmem %s531_s7, 128  ;;  %p860_p3 = scmp.lt.s32.totalorder %s531_s7, %s531_s7 }
  0x2b   :  { %687 = vmatprep.subr.bf16.mxu0 %v686_v9  ;;  %v692_v20 = vpack.c.bf16 %v54_v17, %v51_v16  ;;  %v694_v21 = vpack.c.bf16 %v61_v19, %v58_v18  ;;  %v57_v22 = vld [vmem:[#allocation5 + $0x90] sm:$0xff]  ;;  %v60_v23 = vld [vmem:[#allocation5 + $0xa8] sm:$0xff]  ;;  %v67_v25 = vld [vmem:[#allocation5 + $0xe0] sm:$0xff]  ;;  %p856_p2 = scmp.ne.s32.totalorder %s531_s7, %s855_s8  ;;  %p861_p4 = scmp.lt.s32.totalorder %s855_s8, %s855_s8 }
  0x2c   :  { %v64_v24 = vld [vmem:[#allocation5 + $0xc8] sm:$0xff]  ;;  %v696_v26 = vpack.c.bf16 %v60_v23, %v57_v22  ;;  %v63_v28 = vld [vmem:[#allocation5 + $0xc0] sm:$0xff]  ;;  %v66_v29 = vld [vmem:[#allocation5 + $0xd8] sm:$0xff] }
  0x2d   :  { %v698_v27 = vpack.c.bf16 %v67_v25, %v64_v24  ;;  %v70_v30 = vld [vmem:[#allocation5 + $0xf8] sm:$0xff]  ;;  %v73_v31 = vld [vmem:[#allocation5 + $0x110] sm:$0xff]  ;;  %v700_v32 = vpack.c.bf16 %v66_v29, %v63_v28  ;;  %v72_v35 = vld [vmem:[#allocation5 + $0x108] sm:$0xff]  ;;  %p862_p5 = por %p861_p4, %p860_p3 }
  0x2e   :  { %689 = vmatpush1.bf16.msra.mxu0 %v688_v14  ;;  %v702_v33 = vpack.c.bf16 %v73_v31, %v70_v30  ;;  %v69_v34 = vld [vmem:[#allocation5 + $0xf0] sm:$0xff]  ;;  %v76_v36 = vld [vmem:[#allocation5 + $0x128] sm:$0xff]  ;;  %v79_v37 = vld [vmem:[#allocation5 + $0x140] sm:$0xff] }
  0x2f   :  { %691 = vmatprep.subr.bf16.mxu0 %v690_v15  ;;  %v704_v38 = vpack.c.bf16 %v72_v35, %v69_v34  ;;  %v706_v39 = vpack.c.bf16 %v79_v37, %v76_v36  ;;  %v75_v40 = vld [vmem:[#allocation5 + $0x120] sm:$0xff]  ;;  %v78_v41 = vld [vmem:[#allocation5 + $0x138] sm:$0xff]  ;;  %v85_v43 = vld [vmem:[#allocation5 + $0x170] sm:$0xff]  ;;  %p863_p6 = pnand %p862_p5, %p856_p2 }
  0x30   :  { %v82_v42 = vld [vmem:[#allocation5 + $0x158] sm:$0xff]  ;;  %v708_v44 = vpack.c.bf16 %v78_v41, %v75_v40  ;;  %v81_v46 = vld [vmem:[#allocation5 + $0x150] sm:$0xff]  ;;  %v84_v47 = vld [vmem:[#allocation5 + $0x168] sm:$0xff] }
  0x31   :  { %v710_v45 = vpack.c.bf16 %v85_v43, %v82_v42  ;;  %v712_v48 = vpack.c.bf16 %v84_v47, %v81_v46  ;;  %v939_v49 = vld [vmem:[#allocation2] sm:$0xff]  ;;  %v234_v50 = vld [vmem:[#allocation5 + $0x188] sm:$0xff]  ;;  %v235_v51 = vld [vmem:[#allocation5 + $0x1a0] sm:$0xff] }
  0x32   :  { %693 = vmatpush1.bf16.msra.mxu0 %v692_v20  ;;  %v739_v52 = vpack.c.bf16 %v235_v51, %v234_v50  ;;  %v236_v54 = vld [vmem:[#allocation5 + $0x1b8] sm:$0xff]  ;;  %v237_v55 = vld [vmem:[#allocation5 + $0x1d0] sm:$0xff]  ;;  %v238_v57 = vld [vmem:[#allocation5 + $0x1e8] sm:$0xff]  ;;  %v785_v11 = vpack.i.bf16 %v235_v51, %v234_v50 }
  0x33   :  { %695 = vmatprep.subr.bf16.mxu0 %v694_v21  ;;  %v742_v56 = vpack.c.bf16 %v237_v55, %v236_v54  ;;  %v239_v58 = vld [vmem:[#allocation5 + $0x200] sm:$0xff]  ;;  %v240_v60 = vld [vmem:[#allocation5 + $0x218] sm:$0xff]  ;;  %v241_v61 = vld [vmem:[#allocation5 + $0x230] sm:$0xff]  ;;  %v790_v7 = vpack.i.bf16 %v237_v55, %v236_v54 }
  0x34   :  { %v745_v59 = vpack.c.bf16 %v239_v58, %v238_v57  ;;  %v748_v62 = vpack.c.bf16 %v241_v61, %v240_v60  ;;  %v795_v8 = vpack.i.bf16 %v239_v58, %v238_v57  ;;  %v800_v12 = vpack.i.bf16 %v241_v61, %v240_v60  ;;  %v41_v13 = vld [vmem:[#allocation5 + $0x10] sm:$0xff]  ;;  %v44_v14 = vld [vmem:[#allocation5 + $0x28] sm:$0xff]  ;;  %v47_v15 = vld [vmem:[#allocation5 + $0x40] sm:$0xff] }
  0x35   :  { %791 = vrot.lane.b32.xlu1 %v790_v7, %s890_s1  ;;  %v715_v16 = vpack.c.bf16 %v44_v14, %v41_v13  ;;  %v50_v17 = vld [vmem:[#allocation5 + $0x58] sm:$0xff]  ;;  %v53_v19 = vld [vmem:[#allocation5 + $0x70] sm:$0xff]  ;;  %v56_v20 = vld [vmem:[#allocation5 + $0x88] sm:$0xff] }
  0x36   :  { %697 = vmatpush1.bf16.msra.mxu0 %v696_v26  ;;  %v718_v18 = vpack.c.bf16 %v50_v17, %v47_v15  ;;  %v721_v21 = vpack.c.bf16 %v56_v20, %v53_v19  ;;  %v59_v22 = vld [vmem:[#allocation5 + $0xa0] sm:$0xff]  ;;  %v62_v23 = vld [vmem:[#allocation5 + $0xb8] sm:$0xff]  ;;  %v65_v25 = vld [vmem:[#allocation5 + $0xd0] sm:$0xff] }
  0x37   :  { %699 = vmatprep.subr.bf16.mxu0 %v698_v27  ;;  %716 = vmatpush3.bf16.msra.mxu1 %v715_v16  ;;  %v724_v24 = vpack.c.bf16 %v62_v23, %v59_v22  ;;  %v68_v26 = vld [vmem:[#allocation5 + $0xe8] sm:$0xff]  ;;  %v71_v28 = vld [vmem:[#allocation5 + $0x100] sm:$0xff]  ;;  %v74_v29 = vld [vmem:[#allocation5 + $0x118] sm:$0xff] }
  0x38   :  { %717 = vmatprep.subr.bf16.mxu1 %v888_v53  ;;  %v727_v27 = vpack.c.bf16 %v68_v26, %v65_v25  ;;  %v730_v30 = vpack.c.bf16 %v74_v29, %v71_v28  ;;  %v77_v31 = vld [vmem:[#allocation5 + $0x130] sm:$0xff]  ;;  %v83_v34 = vld [vmem:[#allocation5 + $0x160] sm:$0xff]  ;;  %v86_v35 = vld [vmem:[#allocation5 + $0x178] sm:$0xff] }
  0x39   :  { %796 = vrot.lane.b32.xlu1 %v795_v8, %s890_s1  ;;  %v736_v36 = vpack.c.bf16 %v86_v35, %v83_v34  ;;  %v441_v61 = vld [vmem:[#allocation5 + $0x180] sm:$0xff]  ;;  %v447_v8 = vld [vmem:[#allocation5 + $0x210] sm:$0xff] }
  0x3a   :  { %701 = vmatpush1.bf16.msra.mxu0 %v700_v32  ;;  %v80_v32 = vld [vmem:[#allocation5 + $0x148] sm:$0xff] }
  0x3b   :  { %703 = vmatprep.subr.bf16.mxu0 %v702_v33  ;;  %719 = vmatpush3.bf16.msra.mxu1 %v718_v18  ;;  %v733_v33 = vpack.c.bf16 %v80_v32, %v77_v31 }
  0x3c   :  { %720 = vmatprep.subr.bf16.mxu1 %v888_v53 }
  0x3e   :  { %705 = vmatpush1.bf16.msra.mxu0 %v704_v38 }
  0x3f   :  { %707 = vmatprep.subr.bf16.mxu0 %v706_v39  ;;  %722 = vmatpush3.bf16.msra.mxu1 %v721_v21 }
  0x40   :  { %723 = vmatprep.subr.bf16.mxu1 %v888_v53 }
  0x42   :  { %709 = vmatpush1.bf16.msra.mxu0 %v708_v44 }
  0x43   :  { %711 = vmatprep.subr.bf16.mxu0 %v710_v45  ;;  %725 = vmatpush3.bf16.msra.mxu1 %v724_v24 }
  0x44   :  { %726 = vmatprep.subr.bf16.mxu1 %v888_v53 }
  0x46   :  { %713 = vmatpush1.bf16.msra.mxu0 %v712_v48 }
  0x47   :  { %738 = vmatprep.subr.bf16.mxu0 %v888_v53  ;;  %728 = vmatpush3.bf16.msra.mxu1 %v727_v27 }
  0x48   :  { %729 = vmatprep.subr.bf16.mxu1 %v888_v53 }
  0x49   :  { %152 = vmatmul.mubr.f32.vlgmr.msra.gmra.mrb[0].mxu0 %v939_v49 }
  0x4a   :  { %740 = vmatpush3.bf16.msra.mxu0 %v739_v52  ;;  %641 = vmatprep.mubr.msk.f32.mxu0 %vm889_vm0, %v887_v0 }
  0x4b   :  { %741 = vmatprep.subr.bf16.mxu0 %v888_v53  ;;  %731 = vmatpush3.bf16.msra.mxu1 %v730_v30 }
  0x4c   :  { %732 = vmatprep.subr.bf16.mxu1 %v888_v53 }
  0x4e   :  { %743 = vmatpush3.bf16.msra.mxu0 %v742_v56 }
  0x4f   :  { %744 = vmatprep.subr.bf16.mxu0 %v888_v53  ;;  %734 = vmatpush3.bf16.msra.mxu1 %v733_v33 }
  0x50   :  { %735 = vmatprep.subr.bf16.mxu1 %v888_v53 }
  0x52   :  { %746 = vmatpush3.bf16.msra.mxu0 %v745_v59 }
  0x53   :  { %747 = vmatprep.subr.bf16.mxu0 %v888_v53  ;;  %737 = vmatpush3.bf16.msra.mxu1 %v736_v36 }
  0x54   :  { %750 = vmatprep.subr.bf16.mxu1 %v888_v53 }
  0x56   :  { %749 = vmatpush3.bf16.msra.mxu0 %v748_v62  ;;  %623 = vmatmul.mubr.f32.vlgmr.msra.gmra.mrb[0].mxu1 %v939_v49  ;;  %v442_v62 = vld [vmem:[#allocation5 + $0x198] sm:$0xff] }
  0x57   :  { %762 = vmatprep.subr.bf16.mxu0 %v888_v53  ;;  %660 = vmatprep.mubr.msk.f32.mxu1 %vm889_vm0, %v887_v0 }
  0xa7   :  { %v792_v38 = vpop.permute.xlu1 %791 }
  0xa8   :  { %v794_v42 = vunpack.i.h.bf16 %v792_v38  ;;  %v793_v46 = vunpack.i.l.bf16 %v792_v38 }
  0xaa   :  { %v754_v50 = vpack.c.bf16 %v794_v42, %v793_v46 }
  0xab   :  { %v797_v47 = vpop.permute.xlu1 %796 }
  0xac   :  { %v799_v49 = vunpack.i.h.bf16 %v797_v47  ;;  %v798_v51 = vunpack.i.l.bf16 %v797_v47 }
  0xae   :  { %v757_v52 = vpack.c.bf16 %v799_v49, %v798_v51 }
 0x11c   :  { %v952_v63 = vpop.f32.mrb[0].mxu0 }
 0x11d   :  { %v954_v1 = vpop.f32.mrb[1].mxu0 }
 0x11e   :  { %v229_v2 = vmin.f32 %v954_v1, 0.0  ;;  %vm228_vm2 = vcmp.gt.f32.partialorder %v954_v1, 0.0 }
 0x120   :  { %v230_v3 = vmul.f32 1.442695, %v229_v2  ;;  %v443_v2 = vld [vmem:[#allocation5 + $0x1b0] sm:$0xff] }
 0x122   :  { %805 = vpow2.f32 %v230_v3  ;;  %v444_v3 = vld [vmem:[#allocation5 + $0x1c8] sm:$0xff] }
 0x12c   :  { %v806_v4 = vpop.eup %805 }
 0x12d   :  { %v540_v5 = vadd.f32 -1.0, %v806_v4  ;;  %v766_v4 = vpack.c.bf16 %v444_v3, %v443_v2 }
 0x12f   :  { %v233_v6 = vsel %vm228_vm2, %v954_v1, %v540_v5  ;;  %v445_v5 = vld [vmem:[#allocation5 + $0x1e0] sm:$0xff] }
 0x130   :  { %642 = vmatmul.mubr.msk.f32.vlgmr.msra.gmra.mrb[2].mxu0 %vm242_vm1, %v233_v6  ;;  %v446_v6 = vld [vmem:[#allocation5 + $0x1f8] sm:$0xff] }
 0x131   :  { %679 = vmatprep.mubr.msk.f32.mxu0 %vm889_vm0, %v887_v0  ;;  %v769_v7 = vpack.c.bf16 %v446_v6, %v445_v5 }
 0x203   :  { %v312_v9 = vpop.f32.mrb[2].mxu0 }
 0x204   :  { %317 = vrot.lane.b32.xlu0 %v312_v9, %s890_s1  ;;  %v643_v10 = vpop.f32.mrb[3].mxu0  ;;  %v448_v9 = vld [vmem:[#allocation5 + $0x228] sm:$0xff] }
 0x205   :  { %v772_v10 = vpack.c.bf16 %v448_v9, %v447_v8 }
 0x208   :  { %786 = vrot.lane.b32.xlu0 %v785_v11, %s890_s1 }
 0x20c   :  { %801 = vrot.lane.b32.xlu0 %v800_v12, %s890_s1 }
 0x276   :  { %v318_v37 = vpop.permute.xlu0 %317 }
 0x277   :  { %v320_v39 = vadd.f32 %v318_v37, %v954_v1  ;;  %v763_v1 = vpack.c.bf16 %v442_v62, %v441_v61 }
 0x279   :  { %v322_v40 = vmin.f32 %v320_v39, 0.0  ;;  %vm321_vm3 = vcmp.gt.f32.partialorder %v320_v39, 0.0  ;;  %764 = vmatpush3.bf16.msra.mxu0 %v763_v1 }
 0x27a   :  { %v787_v41 = vpop.permute.xlu0 %786  ;;  %765 = vmatprep.subr.bf16.mxu0 %v888_v53 }
 0x27b   :  { %v323_v43 = vmul.f32 1.442695, %v322_v40  ;;  %v789_v44 = vunpack.i.h.bf16 %v787_v41  ;;  %v788_v45 = vunpack.i.l.bf16 %v787_v41 }
 0x27d   :  { %807 = vpow2.f32 %v323_v43  ;;  %v751_v48 = vpack.c.bf16 %v789_v44, %v788_v45  ;;  %767 = vmatpush3.bf16.msra.mxu0 %v766_v4 }
 0x27e   :  { %v802_v0 = vpop.permute.xlu0 %801  ;;  %768 = vmatprep.subr.bf16.mxu0 %v888_v53 }
 0x27f   :  { %752 = vmatpush3.bf16.msra.mxu1 %v751_v48  ;;  %v804_v54 = vunpack.i.h.bf16 %v802_v0  ;;  %v803_v55 = vunpack.i.l.bf16 %v802_v0 }
 0x280   :  { %753 = vmatprep.subr.bf16.mxu1 %v888_v53 }
 0x281   :  { %v760_v57 = vpack.c.bf16 %v804_v54, %v803_v55  ;;  %770 = vmatpush3.bf16.msra.mxu0 %v769_v7 }
 0x282   :  { %771 = vmatprep.subr.bf16.mxu0 %v888_v53 }
 0x283   :  { %755 = vmatpush3.bf16.msra.mxu1 %v754_v50 }
 0x284   :  { %756 = vmatprep.subr.bf16.mxu1 %v888_v53 }
 0x285   :  { %773 = vmatpush3.bf16.msra.mxu0 %v772_v10 }
 0x287   :  { %v808_v56 = vpop.eup %807  ;;  %758 = vmatpush3.bf16.msra.mxu1 %v757_v52 }
 0x288   :  { %v542_v58 = vadd.f32 -1.0, %v808_v56  ;;  %759 = vmatprep.subr.bf16.mxu1 %v888_v53 }
 0x28a   :  { %v326_v59 = vsel %vm321_vm3, %v320_v39, %v542_v58 }
 0x28b   :  { %328 = vrot.lane.b32.xlu1 %v326_v59, %s890_s1  ;;  %761 = vmatpush3.bf16.msra.mxu1 %v760_v57 }
 0x2fd   :  { %v329_v60 = vpop.permute.xlu1 %328 }
 0x2fe   :  { %661 = vmatmul.mubr.msk.f32.vlgmr.msra.gmra.mrb[0].mxu1 %vm242_vm1, %v329_v60 }
 0x3d1   :  { %v430_v11 = vpop.f32.mrb[0].mxu1 }
 0x3d2   :  { %v436_v12 = vmin.f32 %v430_v11, 0.0  ;;  %v662_v13 = vpop.f32.mrb[1].mxu1  ;;  %vm435_vm4 = vcmp.gt.f32.partialorder %v430_v11, 0.0 }
 0x3d4   :  { %v437_v14 = vmul.f32 1.442695, %v436_v12 }
 0x3d6   :  { %809 = vpow2.f32 %v437_v14 }
 0x3e0   :  { %v810_v15 = vpop.eup %809 }
 0x3e1   :  { %v544_v16 = vadd.f32 -1.0, %v810_v15 }
 0x3e3   :  { %v440_v17 = vsel %vm435_vm4, %v430_v11, %v544_v16 }
 0x3e4   :  { %680 = vmatmul.mubr.msk.f32.vlgmr.msra.gmra.mrb[4].mxu0 %vm242_vm1, %v440_v17 }
 0x4b7   :  { %v518_v18 = vpop.f32.mrb[4].mxu0 }
 0x4b8   :  { %v522_v53 = vadd.f32 %v518_v18, %v952_v63  ;;  %v681_v19 = vpop.f32.mrb[5].mxu0 }
 0x4ba   :  { %523 = vst [vmem:[#allocation7] sm:$0xff] %v522_v53 }
 0x4bb   :  { %866 = shalt.err (!%p863_p6)
}
 0x4bc   :  { %s867_s11 = scalar_lea.hbm %s1003_s2, 128 }
 0x4bd   :  { %p868_p7 = scmp.ne.s32.totalorder %s1003_s2, %s867_s11  ;;  %p871_p8 = scmp.lt.u32.totalorder %s867_s11, %s1003_s2 }
 0x4bf   :  { %p873_p9 = pnand %p871_p8, %p868_p7 }
 0x4c1   :  { %876 = shalt.err (!%p873_p9)
}
 0x4c2   :  { %533 = dma.vmem_to_hbm [thread:$0]  %s531_s7, 128, %s1003_s2, [#allocation4]  }
 0x4c3   :  { %881 = dma.done.wait [#allocation4], 128  }
 0x4c4   :  { %882 = vsyncadd [#allocation4], 4294967168 }
 0x4c5   :  { %537 = vsyncpa [#allocation3], 1 }
 0x4c6   :  { %538 = vsyncpa [#allocation6], 1 }
 0x4c7   :  { %539 = vsyncpa [#allocation4], 1 }

</bundles_post_ra>
